<compile_context>
chip_gen: v7x
topology: tpu7x:2x2x1
jax: 0.10.0
libtpu: 0.0.40
codegen_flags: <defaults>
</compile_context>

<pallas_src>
import functools

import jax
import jax.numpy as jnp
from jax.experimental import pallas as pl
from jax.experimental.pallas import tpu as pltpu

_LANES = 128
_SUBLANES = 8
_DEFAULT_BLOCK_ROWS = 4096


def _round_up(x, m):
    return ((x + m - 1) // m) * m


def _num_tensorcores():
    """Best-effort TensorCore count; 1 (always-safe fallback) if unknown."""
    try:
        info = pltpu.get_tpu_info()
    except Exception:
        return 1
    for attr in ("num_cores", "core_count", "num_tensorcores", "tensorcore_count"):
        v = getattr(info, attr, None)
        if isinstance(v, int) and v >= 1:
            return v
    return 1


def _contrastive_loss_kernel(d_ref, y_ref, out_ref, *, margin, rows_valid,
                             block_rows, tiles_per_core, split, mask_possible):
    if split:
        c = pl.program_id(0)
        t = pl.program_id(1)
        logical_tile = c * tiles_per_core + t
    else:
        t = pl.program_id(0)
        logical_tile = t

    # Output block is resident across the (per-core) reduction axis -> use it
    # as the accumulator; zero it on the first step of each core's range.
    @pl.when(t == 0)
    def _init():
        out_ref[...] = jnp.zeros_like(out_ref)

    # Cast in-kernel: inputs ship in native dtype (bf16/int labels cut HBM
    # bytes); math is f32.
    d = d_ref[...].astype(jnp.float32)
    y = y_ref[...].astype(jnp.float32)
    hinge = jnp.maximum(jnp.float32(margin) - d, 0.0)
    # Keep the multiplicative form so soft (non-binary) labels match the
    # PyTorch reference exactly.
    loss = y * d * d + (1.0 - y) * hinge * hinge

    def _accumulate(tile):
        # (block_rows, 128) -> (8, 128) via sublane-aligned vreg adds (VPU
        # only, no XLU reduce in the hot loop).
        partial = tile.reshape(block_rows // _SUBLANES, _SUBLANES, _LANES).sum(axis=0)
        out_ref[...] += partial

    if not mask_possible:
        # Statically known: every tile is fully valid -> no mask code at all.
        _accumulate(loss)
    else:
        # Only the last real tile and any phantom (clamped) tile pay for the
        # iota/compare/select; steady-state tiles take the fast path.
        needs_mask = (logical_tile + 1) * block_rows > rows_valid

        @pl.when(jnp.logical_not(needs_mask))
        def _fast():
            _accumulate(loss)

        @pl.when(needs_mask)
        def _edge():
            row = jax.lax.broadcasted_iota(jnp.int32, (block_rows, _LANES), 0)
            in_range = logical_tile * block_rows + row < rows_valid
            _accumulate(jnp.where(in_range, loss, 0.0))


def _kernel_sum(d2, y2, margin, rows, block_rows, num_cores):
    """Sum of per-element contrastive losses over a (rows, 128) slab."""
    tr = max(_SUBLANES,
             min(_round_up(block_rows, _SUBLANES), _round_up(rows, _SUBLANES)))
    nt = pl.cdiv(rows, tr)

    if num_cores is None:
        num_cores = _num_tensorcores()
    split = (num_cores >= 2) and (nt >= 2)

    if split:
        tiles_per_core = pl.cdiv(nt, 2)
        grid = (2, tiles_per_core)
        last_logical = 2 * tiles_per_core - 1
        # Clamp so a phantom tile (odd nt) re-reads the last real block; the
        # kernel's logical-row mask zeroes its contribution.
        in_map = lambda c, t: (jnp.minimum(c * tiles_per_core + t, nt - 1), 0)
        out_map = lambda c, t: (c, 0)
        out_rows = 2 * _SUBLANES
        semantics = (getattr(pltpu, "CORE_PARALLEL", "parallel"), "arbitrary")
    else:
        tiles_per_core = nt
        grid = (nt,)
        last_logical = nt - 1
        in_map = lambda t: (t, 0)
        out_map = lambda t: (0, 0)
        out_rows = _SUBLANES
        semantics = ("arbitrary",)

    mask_possible = (last_logical + 1) * tr > rows

    kernel = functools.partial(
        _contrastive_loss_kernel,
        margin=float(margin),
        rows_valid=rows,
        block_rows=tr,
        tiles_per_core=tiles_per_core,
        split=split,
        mask_possible=mask_possible,
    )

    # Double-buffered inputs (4 * tr*128*4 bytes) + elementwise intermediates;
    # 32 MiB floor also lifts v5e's 16 MiB default scoped limit.
    vmem_limit = max(32 * 1024 * 1024, 10 * tr * _LANES * 4)

    out = pl.pallas_call(
        kernel,
        out_shape=jax.ShapeDtypeStruct((out_rows, _LANES), jnp.float32),
        grid_spec=pltpu.PrefetchScalarGridSpec(
            num_scalar_prefetch=0,
            grid=grid,
            in_specs=[
                pl.BlockSpec((tr, _LANES), in_map),
                pl.BlockSpec((tr, _LANES), in_map),
            ],
            out_specs=pl.BlockSpec((_SUBLANES, _LANES), out_map),
        ),
        compiler_params=pltpu.CompilerParams(
            dimension_semantics=semantics,
            vmem_limit_bytes=vmem_limit,
        ),
    )(d2, y2)

    # Single tiny cross-lane reduce on the (8|16, 128) partial.
    return jnp.sum(out)


def contrastive_loss(dist, y, margin=1.0, block_rows=_DEFAULT_BLOCK_ROWS,
                     num_cores=None):
    """Mean contrastive loss: mean(y*d^2 + (1-y)*clamp(margin-d, 0)^2).

    dist, y: arrays of equal shape (flattened internally); any float/int dtype.
    Returns a float32 scalar.
    """
    assert dist.shape == y.shape
    n = int(dist.size)
    assert n > 0

    d_flat = jnp.ravel(dist)
    y_flat = jnp.ravel(y)

    n_main = (n // _LANES) * _LANES   # 128-aligned prefix handled by the kernel
    n_tail = n - n_main               # <128 ragged tail handled in plain JAX

    total = jnp.float32(0.0)

    if n_tail:
        d_t = d_flat[n_main:].astype(jnp.float32)
        y_t = y_flat[n_main:].astype(jnp.float32)
        hinge_t = jnp.maximum(jnp.float32(margin) - d_t, 0.0)
        total = total + jnp.sum(y_t * d_t * d_t + (1.0 - y_t) * hinge_t * hinge_t)

    if n_main:
        rows = n_main // _LANES
        if n_tail:
            d2 = d_flat[:n_main].reshape(rows, _LANES)
            y2 = y_flat[:n_main].reshape(rows, _LANES)
        else:
            # Common case: no pad, no slice, no copy — just a lane-dense view.
            d2 = d_flat.reshape(rows, _LANES)
            y2 = y_flat.reshape(rows, _LANES)
        total = total + _kernel_sum(d2, y2, margin, rows, int(block_rows), num_cores)

    # Note: margin / element count are baked as compile-time constants; a
    # scalar-prefetch variant would only save recompiles across batch sizes.
    return total / jnp.float32(n)


def _reference(dist, y, margin=1.0):
    d = jnp.ravel(dist).astype(jnp.float32)
    yy = jnp.ravel(y).astype(jnp.float32)
    loss = yy * d ** 2 + (1.0 - yy) * jnp.maximum(margin - d, 0.0) ** 2
    return jnp.mean(loss)


if __name__ == "__main__":
    key = jax.random.PRNGKey(0)
    k1, k2, k3, k4 = jax.random.split(key, 4)

    # Test 1: small batch, not a multiple of 128 — exercises the plain-JAX
    # tail path plus a single partial-edge kernel tile (rows=1, tr=8).
    B1 = 200
    dist1 = jax.random.uniform(k1, (B1,), jnp.float32, minval=0.0, maxval=2.0)
    y1 = (jax.random.uniform(k2, (B1,)) > 0.5).astype(jnp.float32)
    out1 = jax.block_until_ready(contrastive_loss(dist1, y1, margin=1.0))
    ref1 = _reference(dist1, y1, margin=1.0)
    assert jnp.allclose(out1, ref1, rtol=1e-5, atol=1e-6), (out1, ref1)

    # Test 2: multiple row tiles with a tiny block_rows — exercises the
    # resident accumulator, the gated edge mask, and (on multi-core chips)
    # the phantom tile of the core split.
    B2 = 5000
    dist2 = jax.random.uniform(k3, (B2,), jnp.float32, minval=0.0, maxval=2.0)
    y2 = (jax.random.uniform(k4, (B2,)) > 0.5).astype(jnp.float32)
    out2 = jax.block_until_ready(contrastive_loss(dist2, y2, margin=1.0, block_rows=8))
    ref2 = _reference(dist2, y2, margin=1.0)
    assert jnp.allclose(out2, ref2, rtol=1e-5, atol=1e-6), (out2, ref2)

    print("KERNEL_OK")
</pallas_src>

<mosaic_0001>
module attributes {stable_mosaic.version = 11 : i64} {
  func.func @_contrastive_loss_kernel(%arg0: i32, %arg1: memref<8x128xf32, #tpu.memory_space<vmem>>, %arg2: memref<8x128xf32, #tpu.memory_space<vmem>>, %arg3: memref<8x128xf32, #tpu.memory_space<vmem>>) attributes {dimension_semantics = [#tpu.dimension_semantics<arbitrary>], iteration_bounds = array<i64: 1>, scalar_prefetch = 0 : i64, scratch_operands = 0 : i64, tpu.core_type = #tpu.core_type<tc>, window_params = [{transform_indices = @transform_0, window_bounds = array<i64: 8, 128>}, {transform_indices = @transform_1, window_bounds = array<i64: 8, 128>}, {pipeline_mode = #tpu.pipeline_mode<synchronous>, transform_indices = @transform_2, window_bounds = array<i64: 8, 128>}]} {
    %c0_i32 = arith.constant 0 : i32
    %0 = arith.cmpi eq, %arg0, %c0_i32 : i32
    %1 = arith.extui %0 : i1 to i32
    %c0_i32_0 = arith.constant 0 : i32
    %2 = arith.cmpi ne, %1, %c0_i32_0 : i32
    scf.if %2 {
      %cst_9 = arith.constant 0.000000e+00 : f32
      %24 = vector.broadcast %cst_9 : f32 to vector<8x128xf32>
      %c0_10 = arith.constant 0 : index
      %c0_11 = arith.constant 0 : index
      %25 = vector.load %arg3[%c0_10, %c0_11] : memref<8x128xf32, #tpu.memory_space<vmem>>, vector<8x128xf32>
      tpu.vector_store %arg3[%c0_10, %c0_11], %24 {strides = array<i32>} : memref<8x128xf32, #tpu.memory_space<vmem>>, vector<8x128xf32>,
    } else {
    }
    %c0 = arith.constant 0 : index
    %c0_1 = arith.constant 0 : index
    %3 = vector.load %arg1[%c0, %c0_1] : memref<8x128xf32, #tpu.memory_space<vmem>>, vector<8x128xf32>
    %c0_2 = arith.constant 0 : index
    %c0_3 = arith.constant 0 : index
    %4 = vector.load %arg2[%c0_2, %c0_3] : memref<8x128xf32, #tpu.memory_space<vmem>>, vector<8x128xf32>
    %cst = arith.constant 1.000000e+00 : f32
    %5 = vector.broadcast %cst : f32 to vector<8x128xf32>
    %6 = arith.subf %5, %3 : vector<8x128xf32>
    %cst_4 = arith.constant 0.000000e+00 : f32
    %7 = vector.broadcast %cst_4 : f32 to vector<8x128xf32>
    %8 = arith.maximumf %6, %7 : vector<8x128xf32>
    %9 = arith.mulf %4, %3 : vector<8x128xf32>
    %10 = arith.mulf %9, %3 : vector<8x128xf32>
    %cst_5 = arith.constant 1.000000e+00 : f32
    %11 = vector.broadcast %cst_5 : f32 to vector<8x128xf32>
    %12 = arith.subf %11, %4 : vector<8x128xf32>
    %13 = arith.mulf %12, %8 : vector<8x128xf32>
    %14 = arith.mulf %13, %8 : vector<8x128xf32>
    %15 = arith.addf %10, %14 : vector<8x128xf32>
    %c1_i32 = arith.constant 1 : i32
    %16 = arith.addi %arg0, %c1_i32 : i32
    %c8_i32 = arith.constant 8 : i32
    %17 = arith.muli %16, %c8_i32 : i32
    %c1_i32_6 = arith.constant 1 : i32
    %18 = arith.cmpi sgt, %17, %c1_i32_6 : i32
    %true = arith.constant true
    %19 = arith.xori %18, %true : i1
    %20 = arith.extui %19 : i1 to i32
    %c0_i32_7 = arith.constant 0 : i32
    %21 = arith.cmpi ne, %20, %c0_i32_7 : i32
    scf.if %21 {
      %24 = vector.shape_cast %15 : vector<8x128xf32> to vector<1x8x128xf32>
      %cst_9 = arith.constant dense<0.000000e+00> : vector<8x128xf32>
      %25 = vector.multi_reduction <add>, %24, %cst_9 [0] : vector<1x8x128xf32> to vector<8x128xf32>
      %c0_10 = arith.constant 0 : index
      %c0_11 = arith.constant 0 : index
      %26 = vector.load %arg3[%c0_10, %c0_11] : memref<8x128xf32, #tpu.memory_space<vmem>>, vector<8x128xf32>
      %27 = arith.addf %26, %25 : vector<8x128xf32>
      %c0_12 = arith.constant 0 : index
      %c0_13 = arith.constant 0 : index
      %28 = vector.load %arg3[%c0_12, %c0_13] : memref<8x128xf32, #tpu.memory_space<vmem>>, vector<8x128xf32>
      tpu.vector_store %arg3[%c0_12, %c0_13], %27 {strides = array<i32>} : memref<8x128xf32, #tpu.memory_space<vmem>>, vector<8x128xf32>,
    } else {
    }
    %22 = arith.extui %18 : i1 to i32
    %c0_i32_8 = arith.constant 0 : i32
    %23 = arith.cmpi ne, %22, %c0_i32_8 : i32
    scf.if %23 {
      %24 = tpu.iota {dimensions = array<i32: 0>} : vector<8x128xi32>
      %c8_i32_9 = arith.constant 8 : i32
      %25 = arith.muli %arg0, %c8_i32_9 : i32
      %26 = vector.broadcast %25 : i32 to vector<8x128xi32>
      %27 = arith.addi %26, %24 : vector<8x128xi32>
      %c1_i32_10 = arith.constant 1 : i32
      %28 = vector.broadcast %c1_i32_10 : i32 to vector<8x128xi32>
      %29 = arith.cmpi slt, %27, %28 : vector<8x128xi32>
      %cst_11 = arith.constant 0.000000e+00 : f32
      %30 = vector.broadcast %cst_11 : f32 to vector<8x128xf32>
      %31 = arith.select %29, %15, %30 : vector<8x128xi1>, vector<8x128xf32>
      %32 = vector.shape_cast %31 : vector<8x128xf32> to vector<1x8x128xf32>
      %cst_12 = arith.constant dense<0.000000e+00> : vector<8x128xf32>
      %33 = vector.multi_reduction <add>, %32, %cst_12 [0] : vector<1x8x128xf32> to vector<8x128xf32>
      %c0_13 = arith.constant 0 : index
      %c0_14 = arith.constant 0 : index
      %34 = vector.load %arg3[%c0_13, %c0_14] : memref<8x128xf32, #tpu.memory_space<vmem>>, vector<8x128xf32>
      %35 = arith.addf %34, %33 : vector<8x128xf32>
      %c0_15 = arith.constant 0 : index
      %c0_16 = arith.constant 0 : index
      %36 = vector.load %arg3[%c0_15, %c0_16] : memref<8x128xf32, #tpu.memory_space<vmem>>, vector<8x128xf32>
      tpu.vector_store %arg3[%c0_15, %c0_16], %35 {strides = array<i32>} : memref<8x128xf32, #tpu.memory_space<vmem>>, vector<8x128xf32>,
    } else {
    }
    return
  }
  func.func @transform_0(%arg0: i32) -> (i32, i32) {
    %c0_i32 = arith.constant 0 : i32
    %c0_i32_0 = arith.constant 0 : i32
    return %arg0, %c0_i32 : i32, i32
  }
  func.func @transform_1(%arg0: i32) -> (i32, i32) {
    %c0_i32 = arith.constant 0 : i32
    %c0_i32_0 = arith.constant 0 : i32
    return %arg0, %c0_i32 : i32, i32
  }
  func.func @transform_2(%arg0: i32) -> (i32, i32) {
    %c0_i32 = arith.constant 0 : i32
    %c0_i32_0 = arith.constant 0 : i32
    %c0_i32_1 = arith.constant 0 : i32
    return %c0_i32, %c0_i32_0 : i32, i32
  }
}

</mosaic_0001>

<bundles_post_ra>
// kernel: tpu_custom_call.1
= control target key start
LH: loop header
LB: loop body
LE: loop exit
PB: predicated region body
PF: predicated region fallthrough
CT: control target
= control target key end

     0   :  { %7 = vsyncpa [#allocation3], 0  ;;  %s180_s0 = inlined_call_operand.hbm [shape: f32[1,128], index: 0, kind: input, shape index: {}]   ;;  %s181_s1 = inlined_call_operand.vmem [shape: f32[1,128], index: 1, kind: input, shape index: {}]   ;;  %s182_s2 = inlined_call_operand.hbm [shape: f32[8,128], index: 2, kind: output, shape index: {}]  }
   0x1   :  { %8 = vsyncpa [#allocation4], 0 }
   0x2   :  { %13 = vsyncadd [#allocation3], 112  ;;  %s134_s9 = smov [#allocation2]   ;;  %s86_s13 = scalar_lea.hbm %s180_s0, 16 }
   0x3   :  { %s14_s10 = sshll.u32 %s134_s9, 4  ;;  %p87_p0 = scmp.ne.s32.totalorder %s180_s0, %s86_s13  ;;  %s15_s10 = int_to_ptr.vmem [resolvable:$true] %s14_s10 }
   0x4   :  { %p90_p1 = scmp.lt.u32.totalorder %s86_s13, %s180_s0 }
   0x6   :  { %p92_p2 = pnand %p90_p1, %p87_p0 }
   0x8   :  { %95 = shalt.err (!%p92_p2)
}
   0x9   :  { %s96_s18 = scalar_lea.vmem %s15_s10, 16  ;;  %s100_s19 = scalar_lea.vmem %s15_s10, 128 }
   0xa   :  { %p97_p3 = scmp.ne.s32.totalorder %s15_s10, %s96_s18  ;;  %p101_p4 = scmp.lt.s32.totalorder %s15_s10, %s15_s10 }
   0xb   :  { %p102_p5 = scmp.lt.s32.totalorder %s100_s19, %s96_s18 }
   0xd   :  { %p103_p6 = por %p102_p5, %p101_p4 }
   0xf   :  { %p104_p7 = pnand %p103_p6, %p97_p3 }
  0x11   :  { %107 = shalt.err (!%p104_p7)
}
  0x12   :  { %s135_s20 = smov 16   ;;  %s136_s21 = smov 1  }
  0x13   :  { %20 = dma.hbm_to_vmem [thread:$0]  %s180_s0, 16, %s15_s10, [#allocation3], %s135_s20, %s135_s20, %s136_s21  }
  0x14   :  { %130 = dma.done.wait [#allocation3], 128  }
  0x15   :  { %131 = vsyncadd [#allocation3], 4294967168  ;;  %v31_v0 = vld [vmem:[#allocation2] sm:$0xff]  ;;  %v55_v2 = vlaneseq  ;;  %s137_s26 = smov [#allocation5]  }
  0x16   :  { %v32_v1 = vld [vmem:[%s181_s1] sm:$0xff]  ;;  %v33_v3 = vsub.f32 1.0, %v31_v0  ;;  %s72_s0 = sshll.u32 %s137_s26, 4  ;;  %s73_s0 = int_to_ptr.vmem [resolvable:$true] %s72_s0 }
  0x17   :  { %v35_v4 = vmul.f32 %v32_v1, %v31_v0  ;;  %v37_v5 = vsub.f32 1.0, %v32_v1  ;;  %v56_v7 = vshrl.u32 %v55_v2, 7  ;;  %s108_s27 = scalar_lea.vmem %s73_s0, 128  ;;  %p113_p9 = scmp.lt.s32.totalorder %s73_s0, %s73_s0 }
  0x18   :  { %v34_v6 = vmax.f32 %v33_v3, 0.0  ;;  %p109_p8 = scmp.ne.s32.totalorder %s73_s0, %s108_s27  ;;  %p114_p10 = scmp.lt.s32.totalorder %s108_s27, %s108_s27 }
  0x19   :  { %v36_v8 = vmul.f32 %v35_v4, %v31_v0  ;;  %vm60_vm0 = vcmp.lt.s32.totalorder %v56_v7, 1 }
  0x1a   :  { %v38_v9 = vmul.f32 %v37_v5, %v34_v6  ;;  %p115_p11 = por %p114_p10, %p113_p9 }
  0x1c   :  { %v39_v10 = vmul.f32 %v38_v9, %v34_v6  ;;  %p116_p12 = pnand %p115_p11, %p109_p8 }
  0x1e   :  { %v40_v11 = vadd.f32 %v39_v10, %v36_v8 }
  0x20   :  { %v61_v12 = vsel %vm60_vm0, %v40_v11, 0.0 }
  0x21   :  { %65 = vst [vmem:[#allocation5] sm:$0xff] %v61_v12 }
  0x22   :  { %119 = shalt.err (!%p116_p12)
}
  0x23   :  { %s120_s29 = scalar_lea.hbm %s182_s2, 128 }
  0x24   :  { %p121_p13 = scmp.ne.s32.totalorder %s182_s2, %s120_s29  ;;  %p124_p0 = scmp.lt.u32.totalorder %s120_s29, %s182_s2 }
  0x26   :  { %p126_p1 = pnand %p124_p0, %p121_p13 }
  0x28   :  { %129 = shalt.err (!%p126_p1)
}
  0x29   :  { %75 = dma.vmem_to_hbm [thread:$0]  %s73_s0, 128, %s182_s2, [#allocation4]  }
  0x2a   :  { %132 = dma.done.wait [#allocation4], 128  }
  0x2b   :  { %133 = vsyncadd [#allocation4], 4294967168 }
  0x2c   :  { %79 = vsyncpa [#allocation3], 1 }
  0x2d   :  { %80 = vsyncpa [#allocation4], 1 }

</bundles_post_ra>
